<compile_context>
chip_gen: v7x
topology: tpu7x:2x2x1
jax: 0.10.0
libtpu: 0.0.40
codegen_flags: <defaults>
</compile_context>

<pallas_src>
import jax
import jax.numpy as jnp
from jax import lax
from jax.experimental import pallas as pl
from jax.experimental.pallas import tpu as pltpu


def up_block_kernel(x_ref, w1_ref, b1_ref, w2_ref, b2_ref, out_ref):
    # x_ref  : (H+2, W*Cin)   f32  row-padded, channel-interleaved (upsampled x ++ skip)
    # w1_ref : (3, W*Cin, W*Cout)  bf16 banded conv1 weights (one slab per dy)
    # w2_ref : (3, W*Cout, W*Cout) bf16 banded conv2 weights
    # b*_ref : (1, W*Cout)    f32  bias tiled along W
    # out_ref: (H, W*Cout)    f32  lane-dense output
    H, WC = out_ref.shape

    # ---- conv1: 3 lane-dense matmuls (bf16 in, f32 accumulate) + bias + ReLU
    acc1 = jnp.zeros((H, WC), jnp.float32)
    for dy in range(3):
        lhs = x_ref[dy:dy + H, :].astype(jnp.bfloat16)
        acc1 = acc1 + jnp.dot(lhs, w1_ref[dy], preferred_element_type=jnp.float32)
    h1 = jnp.maximum(acc1 + b1_ref[...], 0.0)                  # (H, W*Cout)

    # ---- re-pad rows for conv2 (value-level, no VMEM scratch roundtrip);
    #      W-direction padding is already folded into w2's band structure.
    zrow = jnp.zeros((1, WC), jnp.float32)
    h1p = jnp.concatenate([zrow, h1, zrow], axis=0)            # (H+2, W*Cout)

    # ---- conv2 + bias + ReLU
    acc2 = jnp.zeros((H, WC), jnp.float32)
    for dy in range(3):
        lhs = h1p[dy:dy + H, :].astype(jnp.bfloat16)
        acc2 = acc2 + jnp.dot(lhs, w2_ref[dy], preferred_element_type=jnp.float32)
    out_ref[...] = jnp.maximum(acc2 + b2_ref[...], 0.0)


def _banded_conv_weights(w, W):
    """OIHW 3x3 conv weights -> (3, W*Cin, W*Cout) banded matmul slabs.

    big[dy, xin*Cin + ci, x*Cout + co] = w[co, ci, dy, dx] with xin = x+dx-1;
    out-of-range xin are dropped, which realizes the 'SAME' zero padding along
    W inside the weight matrix (the kernel never pads lanes).
    """
    Cout, Cin = w.shape[0], w.shape[1]
    wt = jnp.transpose(w, (2, 3, 1, 0)).astype(jnp.float32)    # (dy, dx, Cin, Cout)
    big = jnp.zeros((3, W * Cin, W * Cout), jnp.float32)
    for dx in range(3):
        for x in range(W):
            xin = x + dx - 1
            if 0 <= xin < W:
                big = big.at[:, xin * Cin:(xin + 1) * Cin,
                             x * Cout:(x + 1) * Cout].set(wt[:, dx])
    return big


def up_block(x_nchw, skip_nchw, w1, b1, w2, b2):
    """UpBlock forward.  x: (N, Cx, H/2, W/2), skip: (N, Cs, H, W), NCHW in/out."""
    N, Cx, h, w = x_nchw.shape
    _, Cs, H, W = skip_nchw.shape
    Cin = Cx + Cs
    Cout = w1.shape[0]

    # TODO(synk): nearest-upsample + channel concat + NCHW->lane-interleaved
    # layout + 1-row halo are wrapper-side input layout prep (pure data
    # movement); the two convs + ReLUs run in the Pallas kernel.
    xu = jnp.repeat(jnp.repeat(x_nchw, 2, axis=2), 2, axis=3)             # (N, Cx, H, W)
    cat = jnp.concatenate([xu.astype(jnp.float32),
                           skip_nchw.astype(jnp.float32)], axis=1)        # (N, Cin, H, W)
    cat = jnp.transpose(cat, (0, 2, 3, 1))                                # NHWC
    cat = jnp.pad(cat, ((0, 0), (1, 1), (0, 0), (0, 0)))                  # row halo only
    xp = cat.reshape(N, H + 2, W * Cin)                                   # lane-dense

    w1b = _banded_conv_weights(w1, W).astype(jnp.bfloat16)    # (3, W*Cin, W*Cout)
    w2b = _banded_conv_weights(w2, W).astype(jnp.bfloat16)    # (3, W*Cout, W*Cout)
    b1l = jnp.tile(b1.astype(jnp.float32), W).reshape(1, W * Cout)
    b2l = jnp.tile(b2.astype(jnp.float32), W).reshape(1, W * Cout)

    out = pl.pallas_call(
        up_block_kernel,
        out_shape=jax.ShapeDtypeStruct((N, H, W * Cout), jnp.float32),
        grid=(N,),
        in_specs=[
            pl.BlockSpec((None, H + 2, W * Cin), lambda n: (n, 0, 0)),
            pl.BlockSpec((3, W * Cin, W * Cout), lambda n: (0, 0, 0)),
            pl.BlockSpec((1, W * Cout), lambda n: (0, 0)),
            pl.BlockSpec((3, W * Cout, W * Cout), lambda n: (0, 0, 0)),
            pl.BlockSpec((1, W * Cout), lambda n: (0, 0)),
        ],
        out_specs=pl.BlockSpec((None, H, W * Cout), lambda n: (n, 0, 0)),
        compiler_params=pltpu.CompilerParams(
            dimension_semantics=("parallel",),        # N>=2 keeps both v7x TCs busy
            vmem_limit_bytes=32 * 1024 * 1024),
    )(xp, w1b, b1l, w2b, b2l)

    out = out.reshape(N, H, W, Cout)
    return jnp.transpose(out, (0, 3, 1, 2))           # back to NCHW


def ref_up_block(x, skip, w1, b1, w2, b2):
    """Pure-JAX reference with the same semantics as the PyTorch UpBlock."""
    xu = jnp.repeat(jnp.repeat(x, 2, axis=2), 2, axis=3)
    y = jnp.concatenate([xu, skip], axis=1)
    dn = ("NCHW", "OIHW", "NCHW")
    y = lax.conv_general_dilated(y, w1, (1, 1), "SAME", dimension_numbers=dn,
                                 precision=lax.Precision.HIGHEST)
    y = jnp.maximum(y + b1[None, :, None, None], 0.0)
    y = lax.conv_general_dilated(y, w2, (1, 1), "SAME", dimension_numbers=dn,
                                 precision=lax.Precision.HIGHEST)
    y = jnp.maximum(y + b2[None, :, None, None], 0.0)
    return y


if __name__ == "__main__":
    N, Cx, Cs, Cout = 2, 4, 4, 8
    h, w = 8, 8
    H, W = 2 * h, 2 * w
    Cin = Cx + Cs

    key = jax.random.PRNGKey(0)
    k1, k2, k3, k4, k5, k6 = jax.random.split(key, 6)
    x = jax.random.normal(k1, (N, Cx, h, w), jnp.float32)
    skip = jax.random.normal(k2, (N, Cs, H, W), jnp.float32)
    w1 = jax.random.normal(k3, (Cout, Cin, 3, 3), jnp.float32) * 0.1
    b1 = jax.random.normal(k4, (Cout,), jnp.float32) * 0.1
    w2 = jax.random.normal(k5, (Cout, Cout, 3, 3), jnp.float32) * 0.1
    b2 = jax.random.normal(k6, (Cout,), jnp.float32) * 0.1

    out = jax.jit(up_block)(x, skip, w1, b1, w2, b2)
    jax.block_until_ready(out)

    out_r = ref_up_block(x, skip, w1, b1, w2, b2)
    assert out.shape == (N, Cout, H, W), f"bad shape {out.shape}"
    max_err = jnp.max(jnp.abs(out - out_r))
    # bf16 MXU operands with f32 accumulation -> ~1e-2-level absolute error.
    assert jnp.allclose(out, out_r, atol=5e-2, rtol=5e-2), f"mismatch, max |err| = {max_err}"
    print("KERNEL_OK")
</pallas_src>

<mosaic_0001>
module attributes {stable_mosaic.version = 11 : i64} {
  func.func @up_block_kernel(%arg0: i32, %arg1: memref<1x18x128xf32, #tpu.memory_space<vmem>>, %arg2: memref<3x128x128xbf16, #tpu.memory_space<vmem>>, %arg3: memref<1x128xf32, #tpu.memory_space<vmem>>, %arg4: memref<3x128x128xbf16, #tpu.memory_space<vmem>>, %arg5: memref<1x128xf32, #tpu.memory_space<vmem>>, %arg6: memref<1x16x128xf32, #tpu.memory_space<vmem>>) attributes {dimension_semantics = [#tpu.dimension_semantics<parallel>], iteration_bounds = array<i64: 2>, scalar_prefetch = 0 : i64, scratch_operands = 0 : i64, tpu.core_type = #tpu.core_type<tc>, window_params = [{transform_indices = @transform_0, window_bounds = array<i64: 1, 18, 128>}, {pipeline_mode = #tpu.pipeline_mode<synchronous>, transform_indices = @transform_1, window_bounds = array<i64: 3, 128, 128>}, {pipeline_mode = #tpu.pipeline_mode<synchronous>, transform_indices = @transform_2, window_bounds = array<i64: 1, 128>}, {pipeline_mode = #tpu.pipeline_mode<synchronous>, transform_indices = @transform_3, window_bounds = array<i64: 3, 128, 128>}, {pipeline_mode = #tpu.pipeline_mode<synchronous>, transform_indices = @transform_4, window_bounds = array<i64: 1, 128>}, {transform_indices = @transform_5, window_bounds = array<i64: 1, 16, 128>}]} {
    %cst = arith.constant 0.000000e+00 : f32
    %0 = vector.broadcast %cst : f32 to vector<16x128xf32>
    %c0 = arith.constant 0 : index
    %c0_0 = arith.constant 0 : index
    %c0_1 = arith.constant 0 : index
    %1 = vector.load %arg1[%c0, %c0_0, %c0_1] : memref<1x18x128xf32, #tpu.memory_space<vmem>>, vector<1x16x128xf32>
    %2 = vector.shape_cast %1 : vector<1x16x128xf32> to vector<16x128xf32>
    %3 = arith.truncf %2 : vector<16x128xf32> to vector<16x128xbf16>
    %c0_2 = arith.constant 0 : index
    %c0_3 = arith.constant 0 : index
    %c0_4 = arith.constant 0 : index
    %4 = vector.load %arg2[%c0_2, %c0_3, %c0_4] : memref<3x128x128xbf16, #tpu.memory_space<vmem>>, vector<1x128x128xbf16>
    %5 = vector.shape_cast %4 : vector<1x128x128xbf16> to vector<128x128xbf16>
    %cst_5 = arith.constant dense<0.000000e+00> : vector<16x128xf32>
    %6 = tpu.matmul %3, %5, %cst_5 {dimension_numbers = #tpu.dot_dimension_numbers<[1], [0], [0], [1], [0, 0, 1, 1], [], []>} : vector<16x128xbf16>, vector<128x128xbf16>, vector<16x128xf32> -> vector<16x128xf32>
    %7 = arith.addf %0, %6 : vector<16x128xf32>
    %c0_6 = arith.constant 0 : index
    %c1 = arith.constant 1 : index
    %c0_7 = arith.constant 0 : index
    %8 = vector.load %arg1[%c0_6, %c1, %c0_7] : memref<1x18x128xf32, #tpu.memory_space<vmem>>, vector<1x16x128xf32>
    %9 = vector.shape_cast %8 : vector<1x16x128xf32> to vector<16x128xf32>
    %10 = arith.truncf %9 : vector<16x128xf32> to vector<16x128xbf16>
    %c1_8 = arith.constant 1 : index
    %c0_9 = arith.constant 0 : index
    %c0_10 = arith.constant 0 : index
    %11 = vector.load %arg2[%c1_8, %c0_9, %c0_10] : memref<3x128x128xbf16, #tpu.memory_space<vmem>>, vector<1x128x128xbf16>
    %12 = vector.shape_cast %11 : vector<1x128x128xbf16> to vector<128x128xbf16>
    %cst_11 = arith.constant dense<0.000000e+00> : vector<16x128xf32>
    %13 = tpu.matmul %10, %12, %cst_11 {dimension_numbers = #tpu.dot_dimension_numbers<[1], [0], [0], [1], [0, 0, 1, 1], [], []>} : vector<16x128xbf16>, vector<128x128xbf16>, vector<16x128xf32> -> vector<16x128xf32>
    %14 = arith.addf %7, %13 : vector<16x128xf32>
    %c0_12 = arith.constant 0 : index
    %c2 = arith.constant 2 : index
    %c0_13 = arith.constant 0 : index
    %15 = vector.load %arg1[%c0_12, %c2, %c0_13] : memref<1x18x128xf32, #tpu.memory_space<vmem>>, vector<1x16x128xf32>
    %16 = vector.shape_cast %15 : vector<1x16x128xf32> to vector<16x128xf32>
    %17 = arith.truncf %16 : vector<16x128xf32> to vector<16x128xbf16>
    %c2_14 = arith.constant 2 : index
    %c0_15 = arith.constant 0 : index
    %c0_16 = arith.constant 0 : index
    %18 = vector.load %arg2[%c2_14, %c0_15, %c0_16] : memref<3x128x128xbf16, #tpu.memory_space<vmem>>, vector<1x128x128xbf16>
    %19 = vector.shape_cast %18 : vector<1x128x128xbf16> to vector<128x128xbf16>
    %cst_17 = arith.constant dense<0.000000e+00> : vector<16x128xf32>
    %20 = tpu.matmul %17, %19, %cst_17 {dimension_numbers = #tpu.dot_dimension_numbers<[1], [0], [0], [1], [0, 0, 1, 1], [], []>} : vector<16x128xbf16>, vector<128x128xbf16>, vector<16x128xf32> -> vector<16x128xf32>
    %21 = arith.addf %14, %20 : vector<16x128xf32>
    %c0_18 = arith.constant 0 : index
    %c0_19 = arith.constant 0 : index
    %22 = vector.load %arg3[%c0_18, %c0_19] : memref<1x128xf32, #tpu.memory_space<vmem>>, vector<1x128xf32>
    %23 = vector.broadcast %22 : vector<1x128xf32> to vector<16x128xf32>
    %24 = arith.addf %21, %23 : vector<16x128xf32>
    %cst_20 = arith.constant 0.000000e+00 : f32
    %25 = vector.broadcast %cst_20 : f32 to vector<16x128xf32>
    %26 = arith.maximumf %24, %25 : vector<16x128xf32>
    %cst_21 = arith.constant 0.000000e+00 : f32
    %27 = vector.broadcast %cst_21 : f32 to vector<1x128xf32>
    %28 = tpu.concatenate %27, %26, %27 in 0 : vector<1x128xf32>, vector<16x128xf32>, vector<1x128xf32> -> vector<18x128xf32>
    %cst_22 = arith.constant 0.000000e+00 : f32
    %29 = vector.broadcast %cst_22 : f32 to vector<16x128xf32>
    %30 = vector.extract_strided_slice %28 {offsets = [0, 0], sizes = [16, 128], strides = [1, 1]} : vector<18x128xf32> to vector<16x128xf32>
    %31 = arith.truncf %30 : vector<16x128xf32> to vector<16x128xbf16>
    %c0_23 = arith.constant 0 : index
    %c0_24 = arith.constant 0 : index
    %c0_25 = arith.constant 0 : index
    %32 = vector.load %arg4[%c0_23, %c0_24, %c0_25] : memref<3x128x128xbf16, #tpu.memory_space<vmem>>, vector<1x128x128xbf16>
    %33 = vector.shape_cast %32 : vector<1x128x128xbf16> to vector<128x128xbf16>
    %cst_26 = arith.constant dense<0.000000e+00> : vector<16x128xf32>
    %34 = tpu.matmul %31, %33, %cst_26 {dimension_numbers = #tpu.dot_dimension_numbers<[1], [0], [0], [1], [0, 0, 1, 1], [], []>} : vector<16x128xbf16>, vector<128x128xbf16>, vector<16x128xf32> -> vector<16x128xf32>
    %35 = arith.addf %29, %34 : vector<16x128xf32>
    %36 = vector.extract_strided_slice %28 {offsets = [1, 0], sizes = [16, 128], strides = [1, 1]} : vector<18x128xf32> to vector<16x128xf32>
    %37 = arith.truncf %36 : vector<16x128xf32> to vector<16x128xbf16>
    %c1_27 = arith.constant 1 : index
    %c0_28 = arith.constant 0 : index
    %c0_29 = arith.constant 0 : index
    %38 = vector.load %arg4[%c1_27, %c0_28, %c0_29] : memref<3x128x128xbf16, #tpu.memory_space<vmem>>, vector<1x128x128xbf16>
    %39 = vector.shape_cast %38 : vector<1x128x128xbf16> to vector<128x128xbf16>
    %cst_30 = arith.constant dense<0.000000e+00> : vector<16x128xf32>
    %40 = tpu.matmul %37, %39, %cst_30 {dimension_numbers = #tpu.dot_dimension_numbers<[1], [0], [0], [1], [0, 0, 1, 1], [], []>} : vector<16x128xbf16>, vector<128x128xbf16>, vector<16x128xf32> -> vector<16x128xf32>
    %41 = arith.addf %35, %40 : vector<16x128xf32>
    %42 = vector.extract_strided_slice %28 {offsets = [2, 0], sizes = [16, 128], strides = [1, 1]} : vector<18x128xf32> to vector<16x128xf32>
    %43 = arith.truncf %42 : vector<16x128xf32> to vector<16x128xbf16>
    %c2_31 = arith.constant 2 : index
    %c0_32 = arith.constant 0 : index
    %c0_33 = arith.constant 0 : index
    %44 = vector.load %arg4[%c2_31, %c0_32, %c0_33] : memref<3x128x128xbf16, #tpu.memory_space<vmem>>, vector<1x128x128xbf16>
    %45 = vector.shape_cast %44 : vector<1x128x128xbf16> to vector<128x128xbf16>
    %cst_34 = arith.constant dense<0.000000e+00> : vector<16x128xf32>
    %46 = tpu.matmul %43, %45, %cst_34 {dimension_numbers = #tpu.dot_dimension_numbers<[1], [0], [0], [1], [0, 0, 1, 1], [], []>} : vector<16x128xbf16>, vector<128x128xbf16>, vector<16x128xf32> -> vector<16x128xf32>
    %47 = arith.addf %41, %46 : vector<16x128xf32>
    %c0_35 = arith.constant 0 : index
    %c0_36 = arith.constant 0 : index
    %48 = vector.load %arg5[%c0_35, %c0_36] : memref<1x128xf32, #tpu.memory_space<vmem>>, vector<1x128xf32>
    %49 = vector.broadcast %48 : vector<1x128xf32> to vector<16x128xf32>
    %50 = arith.addf %47, %49 : vector<16x128xf32>
    %cst_37 = arith.constant 0.000000e+00 : f32
    %51 = vector.broadcast %cst_37 : f32 to vector<16x128xf32>
    %52 = arith.maximumf %50, %51 : vector<16x128xf32>
    %c0_38 = arith.constant 0 : index
    %c0_39 = arith.constant 0 : index
    %c0_40 = arith.constant 0 : index
    %53 = vector.load %arg6[%c0_38, %c0_39, %c0_40] : memref<1x16x128xf32, #tpu.memory_space<vmem>>, vector<1x16x128xf32>
    %54 = vector.shape_cast %53 : vector<1x16x128xf32> to vector<16x128xf32>
    %55 = vector.shape_cast %52 : vector<16x128xf32> to vector<1x16x128xf32>
    tpu.vector_store %arg6[%c0_38, %c0_39, %c0_40], %55 {strides = array<i32>} : memref<1x16x128xf32, #tpu.memory_space<vmem>>, vector<1x16x128xf32>,
    return
  }
  func.func @transform_0(%arg0: i32) -> (i32, i32, i32) {
    %c0_i32 = arith.constant 0 : i32
    %c0_i32_0 = arith.constant 0 : i32
    %c0_i32_1 = arith.constant 0 : i32
    return %arg0, %c0_i32, %c0_i32_0 : i32, i32, i32
  }
  func.func @transform_1(%arg0: i32) -> (i32, i32, i32) {
    %c0_i32 = arith.constant 0 : i32
    %c0_i32_0 = arith.constant 0 : i32
    %c0_i32_1 = arith.constant 0 : i32
    %c0_i32_2 = arith.constant 0 : i32
    return %c0_i32, %c0_i32_0, %c0_i32_1 : i32, i32, i32
  }
  func.func @transform_2(%arg0: i32) -> (i32, i32) {
    %c0_i32 = arith.constant 0 : i32
    %c0_i32_0 = arith.constant 0 : i32
    %c0_i32_1 = arith.constant 0 : i32
    return %c0_i32, %c0_i32_0 : i32, i32
  }
  func.func @transform_3(%arg0: i32) -> (i32, i32, i32) {
    %c0_i32 = arith.constant 0 : i32
    %c0_i32_0 = arith.constant 0 : i32
    %c0_i32_1 = arith.constant 0 : i32
    %c0_i32_2 = arith.constant 0 : i32
    return %c0_i32, %c0_i32_0, %c0_i32_1 : i32, i32, i32
  }
  func.func @transform_4(%arg0: i32) -> (i32, i32) {
    %c0_i32 = arith.constant 0 : i32
    %c0_i32_0 = arith.constant 0 : i32
    %c0_i32_1 = arith.constant 0 : i32
    return %c0_i32, %c0_i32_0 : i32, i32
  }
  func.func @transform_5(%arg0: i32) -> (i32, i32, i32) {
    %c0_i32 = arith.constant 0 : i32
    %c0_i32_0 = arith.constant 0 : i32
    %c0_i32_1 = arith.constant 0 : i32
    return %arg0, %c0_i32, %c0_i32_0 : i32, i32, i32
  }
}

</mosaic_0001>

<bundles_post_ra>
// kernel: tile.13
= control target key start
LH: loop header
LB: loop body
LE: loop exit
PB: predicated region body
PF: predicated region fallthrough
CT: control target
= control target key end

     0   :  { %s28_s0 = inlined_call_operand.vmem [shape: f32[8], index: 0, kind: input, shape index: {}]   ;;  %s29_s1 = inlined_call_operand.vmem [shape: f32[16,8], index: 1, kind: output, shape index: {}]  }
   0x1   :  { %v4_v0 = vld [vmem:[%s28_s0] ss:$0 sm:$0xff] }
   0x2   :  { %5 = vst [vmem:[%s29_s1] sm:$0xff] %v4_v0  ;;  %8 = vst [vmem:[%s29_s1 + $0x8] sm:$0xff] %v4_v0 }

// kernel: tile.14
= control target key start
LH: loop header
LB: loop body
LE: loop exit
PB: predicated region body
PF: predicated region fallthrough
CT: control target
= control target key end

     0   :  { %s131_s10 = smov 120   ;;  %s132_s11 = smov 104   ;;  %vm3_vm0 = vcmask 64512   ;;  %vm9_vm1 = vcmask 1048512   ;;  %vm15_vm2 = vcmask 982912   ;;  %vm21_vm3 = vcmask 917312   ;;  %s207_s0 = inlined_call_operand.vmem [shape: f32[16,8], index: 0, kind: input, shape index: {}]   ;;  %s208_s1 = inlined_call_operand.vmem [shape: f32[1,128], index: 1, kind: output, shape index: {}]  }
   0x1   :  { %v101_v0 = vld [vmem:[%s207_s0 + $0xf] sm:$0x1]   ;;  %v103_v1 = vld [vmem:[%s207_s0 + $0xd] sm:$0x1]   ;;  %v102_v2 = vld [vmem:[%s207_s0 + $0xe] sm:$0x1]  }
   0x2   :  { %7 = vrot.lane.b32.xlu0 %v101_v0, %s131_s10  ;;  %19 = vrot.lane.b32.xlu1 %v103_v1, %s132_s11  ;;  %v104_v3 = vld [vmem:[%s207_s0 + $0xc] sm:$0x1]   ;;  %s133_s16 = smov 112   ;;  %s134_s17 = smov 96   ;;  %v105_v4 = vld [vmem:[%s207_s0 + $0xb] sm:$0x1]  }
   0x3   :  { %v106_v5 = vld [vmem:[%s207_s0 + $0xa] sm:$0x1]   ;;  %v2_v6 = vld [vmem:[%s207_s0] sm:$0x1]   ;;  %s135_s24 = smov 88   ;;  %s136_s25 = smov 80  }
   0x4   :  { %4 = vst.msk [vmem:[#allocation0] sm:$0x1] %vm3_vm0, %v2_v6   ;;  %v107_v7 = vld [vmem:[%s207_s0 + $0x9] sm:$0x1]   ;;  %v108_v8 = vld [vmem:[%s207_s0 + $0x8] sm:$0x1]  }
   0x5   :  { %s137_s30 = smov 72   ;;  %s138_s2 = smov 64   ;;  %v109_v9 = vld [vmem:[%s207_s0 + $0x7] sm:$0x1]   ;;  %v110_v10 = vld [vmem:[%s207_s0 + $0x6] sm:$0x1]  }
   0x6   :  { %13 = vrot.lane.b32.xlu0 %v102_v2, %s133_s16  ;;  %25 = vrot.lane.b32.xlu1 %v104_v3, %s134_s17  ;;  %s139_s7 = smov 56   ;;  %s140_s8 = smov 48   ;;  %v111_v11 = vld [vmem:[%s207_s0 + $0x5] sm:$0x1]   ;;  %v112_v12 = vld [vmem:[%s207_s0 + $0x4] sm:$0x1]  }
   0x7   :  { %s141_s13 = smov 40   ;;  %s142_s14 = smov 32   ;;  %v113_v13 = vld [vmem:[%s207_s0 + $0x3] sm:$0x1]   ;;  %v114_v14 = vld [vmem:[%s207_s0 + $0x2] sm:$0x1]  }
   0x8   :  { %s143_s19 = smov 24   ;;  %s144_s20 = smov 16   ;;  %v115_v15 = vld [vmem:[%s207_s0 + $0x1] sm:$0x1]   ;;  %vm27_vm4 = vcmask 851712   ;;  %vm33_vm5 = vcmask 786112  }
   0x9   :  { %s145_s0 = smov 8   ;;  %vm39_vm6 = vcmask 720512   ;;  %vm45_vm7 = vcmask 654912   ;;  %vm51_vm8 = vcmask 589312   ;;  %vm57_vm9 = vcmask 523712  }
   0xa   :  { %31 = vrot.lane.b32.xlu0 %v105_v4, %s135_s24  ;;  %37 = vrot.lane.b32.xlu1 %v106_v5, %s136_s25  ;;  %vm63_vm10 = vcmask 458112   ;;  %vm69_vm11 = vcmask 392512   ;;  %vm75_vm12 = vcmask 326912   ;;  %vm81_vm13 = vcmask 261312  }
   0xb   :  { %vm87_vm14 = vcmask 195712   ;;  %vm93_vm15 = vcmask 130112  }
   0xe   :  { %43 = vrot.lane.b32.xlu0 %v107_v7, %s137_s30  ;;  %49 = vrot.lane.b32.xlu1 %v108_v8, %s138_s2 }
  0x12   :  { %55 = vrot.lane.b32.xlu0 %v109_v9, %s139_s7  ;;  %61 = vrot.lane.b32.xlu1 %v110_v10, %s140_s8 }
  0x16   :  { %67 = vrot.lane.b32.xlu0 %v111_v11, %s141_s13  ;;  %73 = vrot.lane.b32.xlu1 %v112_v12, %s142_s14 }
  0x1a   :  { %79 = vrot.lane.b32.xlu0 %v113_v13, %s143_s19  ;;  %85 = vrot.lane.b32.xlu1 %v114_v14, %s144_s20 }
  0x1e   :  { %91 = vrot.lane.b32.xlu0 %v115_v15, %s145_s0 }
  0x74   :  { %v8_v16 = vpop.permute.xlu0 %7   ;;  %v20_v17 = vpop.permute.xlu1 %19  }
  0x75   :  { %10 = vst.msk [vmem:[#allocation0] sm:$0x1] %vm9_vm1, %v8_v16  }
  0x78   :  { %v14_v18 = vpop.permute.xlu0 %13   ;;  %v26_v19 = vpop.permute.xlu1 %25  }
  0x79   :  { %16 = vst.msk [vmem:[#allocation0] sm:$0x1] %vm15_vm2, %v14_v18  }
  0x7a   :  { %22 = vst.msk [vmem:[#allocation0] sm:$0x1] %vm21_vm3, %v20_v17  }
  0x7b   :  { %28 = vst.msk [vmem:[#allocation0] sm:$0x1] %vm27_vm4, %v26_v19  }
  0x7c   :  { %v32_v20 = vpop.permute.xlu0 %31   ;;  %v38_v21 = vpop.permute.xlu1 %37  }
  0x7d   :  { %34 = vst.msk [vmem:[#allocation0] sm:$0x1] %vm33_vm5, %v32_v20  }
  0x7e   :  { %40 = vst.msk [vmem:[#allocation0] sm:$0x1] %vm39_vm6, %v38_v21  }
  0x80   :  { %v44_v22 = vpop.permute.xlu0 %43   ;;  %v50_v23 = vpop.permute.xlu1 %49  }
  0x81   :  { %46 = vst.msk [vmem:[#allocation0] sm:$0x1] %vm45_vm7, %v44_v22  }
  0x82   :  { %52 = vst.msk [vmem:[#allocation0] sm:$0x1] %vm51_vm8, %v50_v23  }
  0x84   :  { %v56_v24 = vpop.permute.xlu0 %55   ;;  %v62_v25 = vpop.permute.xlu1 %61  }
  0x85   :  { %58 = vst.msk [vmem:[#allocation0] sm:$0x1] %vm57_vm9, %v56_v24  }
  0x86   :  { %64 = vst.msk [vmem:[#allocation0] sm:$0x1] %vm63_vm10, %v62_v25  }
  0x88   :  { %v68_v26 = vpop.permute.xlu0 %67   ;;  %v74_v27 = vpop.permute.xlu1 %73  }
  0x89   :  { %70 = vst.msk [vmem:[#allocation0] sm:$0x1] %vm69_vm11, %v68_v26  }
  0x8a   :  { %76 = vst.msk [vmem:[#allocation0] sm:$0x1] %vm75_vm12, %v74_v27  }
  0x8c   :  { %v80_v28 = vpop.permute.xlu0 %79   ;;  %v86_v29 = vpop.permute.xlu1 %85  }
  0x8d   :  { %82 = vst.msk [vmem:[#allocation0] sm:$0x1] %vm81_vm13, %v80_v28  }
  0x8e   :  { %88 = vst.msk [vmem:[#allocation0] sm:$0x1] %vm87_vm14, %v86_v29  }
  0x90   :  { %v92_v30 = vpop.permute.xlu0 %91  }
  0x91   :  { %94 = vst.msk [vmem:[#allocation0] sm:$0x1] %vm93_vm15, %v92_v30  }
  0x98   :  { %v98_v31 = vld [vmem:[#allocation0] sm:$0x1] }
  0x99   :  { %100 = vst [vmem:[%s208_s1] sm:$0x1] %v98_v31 }

// kernel: up_block.1
= control target key start
LH: loop header
LB: loop body
LE: loop exit
PB: predicated region body
PF: predicated region fallthrough
CT: control target
= control target key end

     0   :  { %s1390_s18 = smov 0   ;;  %s1633_s0 = inlined_call_operand.vmem [shape: f32[2,18,128], index: 0, kind: input, shape index: {}]   ;;  %s1634_s1 = inlined_call_operand.vmem [shape: bf16[3,128,128], index: 1, kind: input, shape index: {}]   ;;  %s1635_s2 = inlined_call_operand.vmem [shape: f32[1,128], index: 2, kind: input, shape index: {}]   ;;  %s1636_s3 = inlined_call_operand.vmem [shape: bf16[3,128,128], index: 3, kind: input, shape index: {}]   ;;  %s1637_s4 = inlined_call_operand.vmem [shape: f32[1,128], index: 4, kind: input, shape index: {}]   ;;  %s1638_s5 = inlined_call_operand.vmem [shape: f32[2,16,128], index: 5, kind: output, shape index: {}]  }
   0x1 LB: > { %s986_s19 = sadd.s32 4294967295, %s1355_s18   ;;  %p990_p0 = scmp.ge.s32.totalorder %s1355_s18, 1  ;;  %s1355_s18 = sphi %s1390_s18, %s15_s18  }
   0x2   : > { %p187_p1 = scmp.lt.s32.totalorder %s1355_s18, 3 }
   0x4   : > { %p188_p2 = pnand %p990_p0, %p187_p1 }
   0x5   : > { %v1301_v0 = vld [vmem:[%s1634_s1 + $0x40] sm:$0xff] (!%p188_p2)   ;;  %v1357_v1 = vmov (!%p188_p2), 0.0   ;;  %v1303_v3 = vld [vmem:[%s1634_s1 + $0x48] sm:$0xff] (!%p188_p2)   ;;  %vm1358_vm0 = vmmov (!%p188_p2), 0   ;;  %v1305_v5 = vld [vmem:[%s1634_s1 + $0x50] sm:$0xff] (!%p188_p2)   ;;  %p215_p3 = scmp.lt.s32.totalorder (!%p188_p2), %s986_s19, 1 }
   0x6   : > { %191 = sbr.rel (%p188_p2) target bundleno = 555 (0x22b), region = 40  ;;  %1169 = vmatprep.subr.bf16.mxu0 (!%p188_p2), %v1357_v1  ;;  %1189 = vmatprep.subr.bf16.mxu1 (!%p188_p2), %v1357_v1  ;;  %v1302_v2 = vld [vmem:[%s1634_s1] sm:$0xff] (!%p188_p2)   ;;  %v1304_v4 = vld [vmem:[%s1634_s1 + $0x8] sm:$0xff] (!%p188_p2)   ;;  %v1306_v6 = vld [vmem:[%s1634_s1 + $0x10] sm:$0xff] (!%p188_p2)   ;;  %vm567_vm1 = vcmask (!%p188_p2), 1040384   ;;  %vm1359_vm3 = vmmov (!%p188_p2), 1  }
   0x7   : > { %1170 = vmatpush3.bf16.msra.mxu0 (!%p188_p2), %v1301_v0  ;;  %1185 = vmatprep.mubr.msk.bf16.mxu0 (!%p188_p2), %vm1358_vm0, %v1357_v1  ;;  %v1307_v7 = vld [vmem:[%s1634_s1 + $0x58] sm:$0xff] (!%p188_p2)   ;;  %v1309_v9 = vld [vmem:[%s1634_s1 + $0x60] sm:$0xff] (!%p188_p2)   ;;  %v1311_v11 = vld [vmem:[%s1634_s1 + $0x68] sm:$0xff] (!%p188_p2)   ;;  %vm822_vm5 = vcmask (!%p188_p2), 1046528   ;;  %vm611_vm6 = vsmask.f32 (!%p188_p2), 7424 }
   0x8   : > { %1190 = vmatpush3.bf16.msra.mxu1 (!%p188_p2), %v1302_v2  ;;  %1171 = vmatprep.subr.bf16.mxu0 (!%p188_p2), %v1357_v1  ;;  %v1308_v8 = vld [vmem:[%s1634_s1 + $0x18] sm:$0xff] (!%p188_p2)   ;;  %v1310_v10 = vld [vmem:[%s1634_s1 + $0x20] sm:$0xff] (!%p188_p2)   ;;  %v1312_v12 = vld [vmem:[%s1634_s1 + $0x28] sm:$0xff] (!%p188_p2)  }
   0x9   : > { %1191 = vmatprep.subr.bf16.mxu1 (!%p188_p2), %v1357_v1  ;;  %1205 = vmatprep.mubr.msk.bf16.mxu1 (!%p188_p2), %vm1358_vm0, %v1357_v1  ;;  %v1313_v13 = vld [vmem:[%s1634_s1 + $0x70] sm:$0xff] (!%p188_p2)   ;;  %v1315_v15 = vld [vmem:[%s1634_s1 + $0x78] sm:$0xff] (!%p188_p2)   ;;  %v1317_v21 = vld [vmem:[%s1634_s1 + $0x80] sm:$0xff] (!%p188_p2)  }
   0xa   : > { %v1314_v14 = vld [vmem:[%s1634_s1 + $0x30] sm:$0xff] (!%p188_p2)   ;;  %v1316_v17 = vld [vmem:[%s1634_s1 + $0x38] sm:$0xff] (!%p188_p2)   ;;  %v1318_v24 = vld [vmem:[%s1634_s1 + $0x88] sm:$0xff] (!%p188_p2)  }
   0xb   : > { %1172 = vmatpush3.bf16.msra.mxu0 (!%p188_p2), %v1303_v3  ;;  %v1319_v25 = vld [vmem:[%s1634_s1 + $0x90] sm:$0xff] (!%p188_p2)   ;;  %v1320_v26 = vld [vmem:[%s1634_s1 + $0x98] sm:$0xff] (!%p188_p2)   ;;  %v1321_v27 = vld [vmem:[%s1634_s1 + $0xa0] sm:$0xff] (!%p188_p2)  }
   0xc   : > { %1192 = vmatpush3.bf16.msra.mxu1 (!%p188_p2), %v1304_v4  ;;  %1173 = vmatprep.subr.bf16.mxu0 (!%p188_p2), %v1357_v1  ;;  %v1322_v28 = vld [vmem:[%s1634_s1 + $0xa8] sm:$0xff] (!%p188_p2)   ;;  %v1323_v29 = vld [vmem:[%s1634_s1 + $0xb0] sm:$0xff] (!%p188_p2)   ;;  %v1324_v30 = vld [vmem:[%s1634_s1 + $0xb8] sm:$0xff] (!%p188_p2)  }
   0xd   : > { %1193 = vmatprep.subr.bf16.mxu1 %v1357_v1  ;;  %s1640_s19 = smov (!%p215_p3, %s986_s19), 1  ;;  %v1325_v34 = vld [vmem:[%s1636_s3] sm:$0xff]   ;;  %v1326_v36 = vld [vmem:[%s1636_s3 + $0x8] sm:$0xff]   ;;  %v1328_v38 = vld [vmem:[%s1636_s3 + $0x10] sm:$0xff]  }
   0xe   : > { %s1289_s15 = smul.u32 24, %s1640_s19  ;;  %v1327_v35 = vld [vmem:[%s1636_s3 + $0x40] sm:$0xff]   ;;  %v1329_v37 = vld [vmem:[%s1636_s3 + $0x48] sm:$0xff]   ;;  %v1331_v39 = vld [vmem:[%s1636_s3 + $0x50] sm:$0xff]   ;;  %s1114_s7 = sshll.u32 %s1640_s19, 4 }
   0xf   : > { %1174 = vmatpush3.bf16.msra.mxu0 %v1305_v5  ;;  %v1330_v40 = vld [vmem:[%s1636_s3 + $0x18] sm:$0xff]   ;;  %v1332_v41 = vld [vmem:[%s1636_s3 + $0x20] sm:$0xff]   ;;  %v1334_v43 = vld [vmem:[%s1636_s3 + $0x28] sm:$0xff]   ;;  %s224_s10 = scalar_lea.vmem %s1638_s5, %s1114_s7 }
  0x10   : > { %1194 = vmatpush3.bf16.msra.mxu1 %v1306_v6  ;;  %1175 = vmatprep.subr.bf16.mxu0 %v1357_v1  ;;  %s1460_s24 = scalar_lea.vmem %s1633_s0, %s1289_s15  ;;  %v1333_v42 = vld [vmem:[%s1636_s3 + $0x58] sm:$0xff]   ;;  %v1335_v44 = vld [vmem:[%s1636_s3 + $0x60] sm:$0xff]   ;;  %v1336_v45 = vld [vmem:[%s1636_s3 + $0x30] sm:$0xff]  }
  0x11   : > { %1195 = vmatprep.subr.bf16.mxu1 %v1357_v1  ;;  %v245_v16 = vld [vmem:[%s1460_s24 + $0x1] sm:$0xff]  ;;  %v246_v18 = vld [vmem:[%s1460_s24 + $0x9] sm:$0xff]  ;;  %v1338_v47 = vld [vmem:[%s1636_s3 + $0x38] sm:$0xff]  }
  0x12   : > { %v226_v19 = vld [vmem:[%s1460_s24] sm:$0xff]  ;;  %v227_v20 = vld [vmem:[%s1460_s24 + $0x8] sm:$0xff]  ;;  %v247_v22 = vpack.c.bf16 %v246_v18, %v245_v16  ;;  %v1339_v48 = vld [vmem:[%s1636_s3 + $0x70] sm:$0xff]  }
  0x13   : > { %1176 = vmatpush3.bf16.msra.mxu0 %v1307_v7  ;;  %v228_v23 = vpack.c.bf16 %v227_v20, %v226_v19  ;;  %v443_v31 = vld [vmem:[%s1460_s24 + $0x2] sm:$0xff]  ;;  %v444_v32 = vld [vmem:[%s1460_s24 + $0xa] sm:$0xff]  ;;  %v1340_v49 = vld [vmem:[%s1636_s3 + $0x78] sm:$0xff]  }
  0x14   : > { %1196 = vmatpush3.bf16.msra.mxu1 %v1308_v8  ;;  %1177 = vmatprep.subr.bf16.mxu0 %v1357_v1  ;;  %v445_v33 = vpack.c.bf16 %v444_v32, %v443_v31  ;;  %v1337_v46 = vld [vmem:[%s1636_s3 + $0x68] sm:$0xff]   ;;  %v1050_v61 = vld [vmem:[%s1635_s2] ss:$0 sm:$0xff]  ;;  %vm1083_vm2 = vmneg %vm567_vm1 }
  0x15   : > { %1197 = vmatprep.subr.bf16.mxu1 %v1357_v1  ;;  %vm1084_vm4 = vmpackc.low %vm1359_vm3, %vm1083_vm2  ;;  %v1346_v31 = vld [vmem:[%s1636_s3 + $0xa8] sm:$0xff]   ;;  %v1347_v32 = vld [vmem:[%s1636_s3 + $0xb0] sm:$0xff]  }
  0x17   : > { %1178 = vmatpush3.bf16.msra.mxu0 %v1309_v9 }
  0x18   : > { %1198 = vmatpush3.bf16.msra.mxu1 %v1310_v10  ;;  %1179 = vmatprep.subr.bf16.mxu0 %v1357_v1 }
  0x19   : > { %1199 = vmatprep.subr.bf16.mxu1 %v1357_v1 }
  0x1b   : > { %1180 = vmatpush3.bf16.msra.mxu0 %v1311_v11 }
  0x1c   : > { %1200 = vmatpush3.bf16.msra.mxu1 %v1312_v12  ;;  %1181 = vmatprep.subr.bf16.mxu0 %v1357_v1 }
  0x1d   : > { %1201 = vmatprep.subr.bf16.mxu1 %v1357_v1 }
  0x1f   : > { %1182 = vmatpush3.bf16.msra.mxu0 %v1313_v13 }
  0x20   : > { %1202 = vmatpush3.bf16.msra.mxu1 %v1314_v14  ;;  %1183 = vmatprep.subr.bf16.mxu0 %v1357_v1 }
  0x21   : > { %1203 = vmatprep.subr.bf16.mxu1 %v1357_v1 }
  0x23   : > { %1184 = vmatpush3.bf16.msra.mxu0 %v1315_v15 }
  0x24   : > { %1204 = vmatpush3.bf16.msra.mxu1 %v1316_v17  ;;  %1209 = vmatprep.subr.bf16.mxu0 %v1357_v1 }
  0x25   : > { %1229 = vmatprep.subr.bf16.mxu1 %v1357_v1 }
  0x26   : > { %1186 = vmatmul.mubr.bf16.vlgmr.msra.gmra.mrb[0].mxu0 %v247_v22 }
  0x27   : > { %1206 = vmatmul.mubr.bf16.vlgmr.msra.gmra.mrb[0].mxu1 %v228_v23  ;;  %1210 = vmatpush3.bf16.msra.mxu0 %v1317_v21 }
  0x28   : > { %1211 = vmatprep.subr.bf16.mxu0 %v1357_v1  ;;  %1225 = vmatprep.mubr.msk.bf16.mxu0 %vm1358_vm0, %v1357_v1 }
  0x29   : > { %1245 = vmatprep.mubr.msk.bf16.mxu1 %vm1358_vm0, %v1357_v1  ;;  %1230 = vmatpush3.bf16.msra.mxu1 %v1327_v35 }
  0x2a   : > { %1231 = vmatprep.subr.bf16.mxu1 %v1357_v1 }
  0x2b   : > { %1212 = vmatpush3.bf16.msra.mxu0 %v1318_v24 }
  0x2c   : > { %1213 = vmatprep.subr.bf16.mxu0 %v1357_v1 }
  0x2d   : > { %1232 = vmatpush3.bf16.msra.mxu1 %v1329_v37 }
  0x2e   : > { %1233 = vmatprep.subr.bf16.mxu1 %v1357_v1 }
  0x2f   : > { %1214 = vmatpush3.bf16.msra.mxu0 %v1319_v25  ;;  %v1341_v25 = vld [vmem:[%s1636_s3 + $0x80] sm:$0xff]  }
  0x30   : > { %1215 = vmatprep.subr.bf16.mxu0 %v1357_v1 }
  0x31   : > { %1234 = vmatpush3.bf16.msra.mxu1 %v1331_v39 }
  0x32   : > { %1235 = vmatprep.subr.bf16.mxu1 %v1357_v1 }
  0x33   : > { %1216 = vmatpush3.bf16.msra.mxu0 %v1320_v26 }
  0x34   : > { %1217 = vmatprep.subr.bf16.mxu0 %v1357_v1 }
  0x35   : > { %1236 = vmatpush3.bf16.msra.mxu1 %v1333_v42 }
  0x36   : > { %1237 = vmatprep.subr.bf16.mxu1 %v1357_v1 }
  0x37   : > { %1218 = vmatpush3.bf16.msra.mxu0 %v1321_v27  ;;  %v1342_v27 = vld [vmem:[%s1636_s3 + $0x88] sm:$0xff]  }
  0x38   : > { %1219 = vmatprep.subr.bf16.mxu0 %v1357_v1 }
  0x39   : > { %1238 = vmatpush3.bf16.msra.mxu1 %v1335_v44 }
  0x3a   : > { %1239 = vmatprep.subr.bf16.mxu1 %v1357_v1 }
  0x3b   : > { %1220 = vmatpush3.bf16.msra.mxu0 %v1322_v28  ;;  %v1343_v28 = vld [vmem:[%s1636_s3 + $0x90] sm:$0xff]  }
  0x3c   : > { %1221 = vmatprep.subr.bf16.mxu0 %v1357_v1 }
  0x3d   : > { %1240 = vmatpush3.bf16.msra.mxu1 %v1337_v46 }
  0x3e   : > { %1241 = vmatprep.subr.bf16.mxu1 %v1357_v1 }
  0x3f   : > { %1222 = vmatpush3.bf16.msra.mxu0 %v1323_v29  ;;  %v1344_v29 = vld [vmem:[%s1636_s3 + $0x98] sm:$0xff]  }
  0x40   : > { %1223 = vmatprep.subr.bf16.mxu0 %v1357_v1 }
  0x41   : > { %1242 = vmatpush3.bf16.msra.mxu1 %v1339_v48 }
  0x42   : > { %1243 = vmatprep.subr.bf16.mxu1 %v1357_v1 }
  0x43   : > { %1224 = vmatpush3.bf16.msra.mxu0 %v1324_v30  ;;  %v1345_v30 = vld [vmem:[%s1636_s3 + $0xa0] sm:$0xff]  }
  0x44   : > { %1249 = vmatprep.subr.bf16.mxu0 %v1357_v1 }
  0x45   : > { %1244 = vmatpush3.bf16.msra.mxu1 %v1340_v49 }
  0x46   : > { %1226 = vmatmul.mubr.bf16.vlgmr.msra.gmra.mrb[4].mxu0 %v445_v33  ;;  %1269 = vmatprep.subr.bf16.mxu1 %v1357_v1  ;;  %v1348_v33 = vld [vmem:[%s1636_s3 + $0xb8] sm:$0xff]  }
  0x47   : > { %1265 = vmatprep.mubr.msk.bf16.mxu0 %vm1358_vm0, %v1357_v1  ;;  %1250 = vmatpush3.bf16.msra.mxu0 %v1325_v34 }
  0x48   : > { %1251 = vmatprep.subr.bf16.mxu0 %v1357_v1 }
  0x4b   : > { %1252 = vmatpush3.bf16.msra.mxu0 %v1326_v36 }
  0x4c   : > { %1253 = vmatprep.subr.bf16.mxu0 %v1357_v1 }
  0x4f   : > { %1254 = vmatpush3.bf16.msra.mxu0 %v1328_v38 }
  0x50   : > { %1255 = vmatprep.subr.bf16.mxu0 %v1357_v1 }
  0x53   : > { %1256 = vmatpush3.bf16.msra.mxu0 %v1330_v40 }
  0x54   : > { %1257 = vmatprep.subr.bf16.mxu0 %v1357_v1 }
  0x57   : > { %1258 = vmatpush3.bf16.msra.mxu0 %v1332_v41 }
  0x58   : > { %1259 = vmatprep.subr.bf16.mxu0 %v1357_v1 }
  0x5b   : > { %1260 = vmatpush3.bf16.msra.mxu0 %v1334_v43 }
  0x5c   : > { %1261 = vmatprep.subr.bf16.mxu0 %v1357_v1 }
  0x5f   : > { %1262 = vmatpush3.bf16.msra.mxu0 %v1336_v45  ;;  %v1111_v45 = vld [vmem:[%s1637_s4] ss:$0 sm:$0xff] }
  0x60   : > { %1263 = vmatprep.subr.bf16.mxu0 %v1357_v1 }
  0x63   : > { %1264 = vmatpush3.bf16.msra.mxu0 %v1338_v47 }
  0xf9   : > { %v347_v50 = vpop.f32.mrb[0].mxu0 }
  0xfa   : > { %v436_v51 = vpop.f32.mrb[0].mxu1  ;;  %v1187_v52 = vpop.f32.mrb[1].mxu0 }
  0xfb   : > { %v437_v53 = vadd.f32 %v436_v51, %v347_v50  ;;  %v1207_v54 = vpop.f32.mrb[1].mxu1  ;;  %v350_v55 = vpop.f32.mrb[2].mxu0 }
  0xfc   : > { %v439_v56 = vpop.f32.mrb[2].mxu1  ;;  %v1188_v57 = vpop.f32.mrb[3].mxu0 }
  0xfd   : > { %v440_v58 = vadd.f32 %v439_v56, %v350_v55  ;;  %v1208_v59 = vpop.f32.mrb[3].mxu1 }
 0x119   : > { %v545_v60 = vpop.f32.mrb[4].mxu0 }
 0x11a   : > { %v552_v62 = vadd.f32 %v545_v60, %v437_v53  ;;  %v1227_v63 = vpop.f32.mrb[5].mxu0 }
 0x11b   : > { %v548_v0 = vpop.f32.mrb[6].mxu0 }
 0x11c   : > { %v561_v2 = vadd.f32 %v1050_v61, %v552_v62  ;;  %v553_v3 = vadd.f32 %v548_v0, %v440_v58  ;;  %v1228_v4 = vpop.f32.mrb[7].mxu0 }
 0x11e   : > { %v563_v5 = vmax.f32 %v561_v2, 0.0  ;;  %v562_v6 = vadd.f32 %v1050_v61, %v553_v3 }
 0x120   : > { %v568_v7 = vrot.slane %v563_v5, 7  ;;  %v564_v8 = vmax.f32 %v562_v6, 0.0 }
 0x122   : > { %v569_v9 = vrot.slane %v564_v8, 7  ;;  %v574_v10 = vsel %vm567_vm1, 0.0, %v568_v7 }
 0x124   : > { %v570_v11 = vsel %vm567_vm1, %v568_v7, %v569_v9  ;;  %v575_v12 = vsel %vm567_vm1, %v569_v9, 0.0 }
 0x125   : > { %v576_v13 = vpack.c.bf16 %v570_v11, %v574_v10  ;;  %v593_v14 = vpack.c.bf16 %v575_v12, %v575_v12  ;;  %v1085_v15 = vpack.c.bf16 %v570_v11, %v568_v7 }
 0x127   : > { %v620_v16 = vshll.u32 %v593_v14, 16  ;;  %v824_v17 = vrot.slane %v593_v14, 1  ;;  %1266 = vmatmul.mubr.msk.bf16.vlgmr.msra.gmra.mrb[8].mxu0 %vm1084_vm4, %v1085_v15  ;;  %v615_v18 = vshll.u32 %v576_v13, 16  ;;  %v823_v19 = vrot.slane %v576_v13, 1 }
 0x128   : > { %v613_v20 = vshrl.u32 %v576_v13, 16 }
 0x129   : > { %v617_v21 = vrot.slane %v615_v18, 1  ;;  %v825_v22 = vsel %vm822_vm5, %v823_v19, %v824_v17  ;;  %v622_v24 = vrot.slane %v620_v16, 1 }
 0x12b   : > { %v618_v23 = vor.u32 %v617_v21, %v613_v20 }
 0x12d   : > { %v623_v26 = vsel %vm611_vm6, %v618_v23, %v622_v24 }
 0x12e   : > { %1246 = vmatmul.mubr.bf16.vlgmr.msra.gmra.mrb[4].mxu1 %v623_v26 }
 0x12f   : > { %1270 = vmatpush3.bf16.msra.mxu1 %v1341_v25  ;;  %1285 = vmatprep.mubr.msk.bf16.mxu1 %vm1358_vm0, %v1357_v1 }
 0x130   : > { %1271 = vmatprep.subr.bf16.mxu1 %v1357_v1 }
 0x133   : > { %1272 = vmatpush3.bf16.msra.mxu1 %v1342_v27 }
 0x134   : > { %1273 = vmatprep.subr.bf16.mxu1 %v1357_v1 }
 0x137   : > { %1274 = vmatpush3.bf16.msra.mxu1 %v1343_v28 }
 0x138   : > { %1275 = vmatprep.subr.bf16.mxu1 %v1357_v1 }
 0x13b   : > { %1276 = vmatpush3.bf16.msra.mxu1 %v1344_v29 }
 0x13c   : > { %1277 = vmatprep.subr.bf16.mxu1 %v1357_v1 }
 0x13f   : > { %1278 = vmatpush3.bf16.msra.mxu1 %v1345_v30 }
 0x140   : > { %1279 = vmatprep.subr.bf16.mxu1 %v1357_v1 }
 0x143   : > { %1280 = vmatpush3.bf16.msra.mxu1 %v1346_v31 }
 0x144   : > { %1281 = vmatprep.subr.bf16.mxu1 %v1357_v1 }
 0x147   : > { %1282 = vmatpush3.bf16.msra.mxu1 %v1347_v32 }
 0x148   : > { %1283 = vmatprep.subr.bf16.mxu1 %v1357_v1 }
 0x14b   : > { %1284 = vmatpush3.bf16.msra.mxu1 %v1348_v33 }
 0x14e   : > { %1286 = vmatmul.mubr.bf16.vlgmr.msra.gmra.mrb[8].mxu1 %v825_v22 }
 0x1fa   : > { %v796_v34 = vpop.f32.mrb[8].mxu0 }
 0x1fb   : > { %v1267_v35 = vpop.f32.mrb[9].mxu0 }
 0x1fc   : > { %v799_v36 = vpop.f32.mrb[10].mxu0 }
 0x1fd   : > { %v1268_v37 = vpop.f32.mrb[11].mxu0 }
 0x201   : > { %v707_v38 = vpop.f32.mrb[4].mxu1 }
 0x202   : > { %v797_v39 = vadd.f32 %v796_v34, %v707_v38  ;;  %v1247_v40 = vpop.f32.mrb[5].mxu1 }
 0x203   : > { %v710_v41 = vpop.f32.mrb[6].mxu1 }
 0x204   : > { %v800_v42 = vadd.f32 %v799_v36, %v710_v41  ;;  %v1248_v43 = vpop.f32.mrb[7].mxu1 }
 0x221   : > { %v909_v44 = vpop.f32.mrb[8].mxu1 }
 0x222   : > { %v916_v46 = vadd.f32 %v909_v44, %v797_v39  ;;  %v1287_v1 = vpop.f32.mrb[9].mxu1 }
 0x223   : > { %v912_v47 = vpop.f32.mrb[10].mxu1 }
 0x224   : > { %v925_v48 = vadd.f32 %v1111_v45, %v916_v46  ;;  %v917_v49 = vadd.f32 %v912_v47, %v800_v42  ;;  %v1288_v50 = vpop.f32.mrb[11].mxu1 }
 0x226   : > { %v927_v51 = vmax.f32 %v925_v48, 0.0  ;;  %v926_v52 = vadd.f32 %v1111_v45, %v917_v49 }
 0x228   : > { %929 = vst [vmem:[%s224_s10] sm:$0xff] %v927_v51  ;;  %v928_v53 = vmax.f32 %v926_v52, 0.0 }
 0x22a   : > { %930 = vst [vmem:[%s224_s10 + $0x8] sm:$0xff] %v928_v53 }
 0x22b PF: > { %s15_s18 = sadd.s32 1, %s1355_s18  }
 0x22c   : > { %p12_p4 = scmp.ge.s32.totalorder %s15_s18, 4  }
 0x22e   :  { %14 = sbr.rel (!%p12_p4) target bundleno = 1 (0x1), region = 74 }

</bundles_post_ra>
